<compile_context>
chip_gen: v5e
topology: v5e:2x2
jax: 0.10.0
libtpu: 0.0.40
codegen_flags: <defaults>
</compile_context>

<pallas_src>
import functools
import math

import jax
import jax.numpy as jnp
from jax.experimental import pallas as pl
from jax.experimental.pallas import tpu as pltpu

HIDDEN_SIZE = 98
INPUT_SIZE = 24
NUM_CLASSES = 10
PROB = 0.25  # dropout prob; identity in eval mode (training=False)

LANE = 128  # lane width used for padded hidden-layer outputs


def _round_up(x, m):
    return ((x + m - 1) // m) * m


def _mlp_kernel(x_ref,
                w1_ref, b1_ref,
                w2_ref, b2_ref,
                w3_ref, b3_ref,
                w4_ref, b4_ref,
                o_ref):
    # fc1 + bias + ReLU (dropout is identity at inference).
    # x arrives in f32 from HBM; cast to bf16 in-kernel (free VPU slot) so the
    # wrapper never materializes a separate bf16 copy in HBM.
    x_bf16 = x_ref[...].astype(jnp.bfloat16)
    h = jnp.dot(x_bf16, w1_ref[...], preferred_element_type=jnp.float32)
    h = jnp.maximum(h + b1_ref[...], 0.0)
    # fc2 + ReLU
    h = jnp.dot(h.astype(jnp.bfloat16), w2_ref[...],
                preferred_element_type=jnp.float32)
    h = jnp.maximum(h + b2_ref[...], 0.0)
    # fc3 + ReLU
    h = jnp.dot(h.astype(jnp.bfloat16), w3_ref[...],
                preferred_element_type=jnp.float32)
    h = jnp.maximum(h + b3_ref[...], 0.0)
    # fc4 (logits, no activation)
    h = jnp.dot(h.astype(jnp.bfloat16), w4_ref[...],
                preferred_element_type=jnp.float32)
    o_ref[...] = (h + b4_ref[...]).astype(o_ref.dtype)
    # TODO(synk): training-mode dropout (PROB=0.25) not implemented; forward
    # matches PyTorch eval() semantics where F.dropout is the identity.


def prepare_params(params):
    """Pad weights/biases to lane-friendly shapes and cast weights to bf16.

    fan_out of every hidden layer is zero-padded to 128; the next layer's
    fan_in follows the padded width (extra rows are zero, so they contribute
    nothing).  The final layer keeps its natural 10-wide output.  Biases are
    zero-padded and kept in f32.
    """
    prepared = []
    in_dim = INPUT_SIZE  # x keeps its natural 24 lanes (full-dim block)
    n = len(params)
    for li, (w, b) in enumerate(params):
        fan_in, fan_out = w.shape
        out_pad = fan_out if li == n - 1 else _round_up(fan_out, LANE)
        wp = jnp.zeros((in_dim, out_pad), jnp.float32).at[:fan_in, :fan_out].set(w)
        bp = jnp.zeros((1, out_pad), jnp.float32).at[:, :fan_out].set(
            b.reshape(1, -1))
        prepared.append((wp.astype(jnp.bfloat16), bp))
        in_dim = out_pad
    return prepared


def _vmem_limit_bytes():
    """Per-generation VMEM budget: ~3/4 of physical, capped at 96 MiB.

    v7x (64 MiB physical) -> 48 MiB; v5e/v6e (128 MiB) -> 96 MiB.
    Falls back to a safe 48 MiB if the hardware query is unavailable.
    """
    try:
        cap = pltpu.get_tpu_info().vmem_capacity_bytes
        return min((cap * 3) // 4, 96 * 1024 * 1024)
    except Exception:
        return 48 * 1024 * 1024


def neural_net_forward(x, prepared_params, *, block_b=1024):
    """x: (B, 24) f32 -> logits (B, 10) f32.  prepared_params from prepare_params."""
    (w1, b1), (w2, b2), (w3, b3), (w4, b4) = prepared_params
    B = x.shape[0]

    # Batch tile: multiple of 16 (bf16 sublane tile for the intermediates),
    # capped at block_b, and additionally capped so the batch grid has at
    # least 2 steps -- lets v7x shard the "parallel" axis over both TCs.
    block_b = max(16, (block_b // 16) * 16)
    tb = min(block_b, _round_up(pl.cdiv(B, 2), 16))
    grid = (pl.cdiv(B, tb),)

    def const_spec(shape):
        # Weights / biases: constant block index -> fetched once, VMEM-resident.
        return pl.BlockSpec(shape, lambda i: (0, 0))

    in_specs = [
        pl.BlockSpec((tb, INPUT_SIZE), lambda i: (i, 0)),
        const_spec(w1.shape), const_spec(b1.shape),
        const_spec(w2.shape), const_spec(b2.shape),
        const_spec(w3.shape), const_spec(b3.shape),
        const_spec(w4.shape), const_spec(b4.shape),
    ]

    return pl.pallas_call(
        _mlp_kernel,
        out_shape=jax.ShapeDtypeStruct((B, NUM_CLASSES), jnp.float32),
        grid=grid,
        in_specs=in_specs,
        out_specs=pl.BlockSpec((tb, NUM_CLASSES), lambda i: (i, 0)),
        compiler_params=pltpu.CompilerParams(
            dimension_semantics=("parallel",),      # v7x megacore sharding
            vmem_limit_bytes=_vmem_limit_bytes(),   # per-generation budget
        ),
    )(x, w1, b1, w2, b2, w3, b3, w4, b4)


def init_params(key):
    """Deterministic init mimicking nn.Linear default (U[-1/sqrt(fan_in), +])."""
    dims = [(INPUT_SIZE, HIDDEN_SIZE),
            (HIDDEN_SIZE, HIDDEN_SIZE),
            (HIDDEN_SIZE, HIDDEN_SIZE // 2),
            (HIDDEN_SIZE // 2, NUM_CLASSES)]
    params = []
    for (fan_in, fan_out) in dims:
        key, kw, kb = jax.random.split(key, 3)
        bound = 1.0 / math.sqrt(fan_in)
        # stored as (in, out): y = x @ W + b
        w = jax.random.uniform(kw, (fan_in, fan_out), jnp.float32, -bound, bound)
        b = jax.random.uniform(kb, (1, fan_out), jnp.float32, -bound, bound)
        params.append((w, b))
    return params


def reference_forward_bf16(x, params):
    """Pure-JAX reference matching the kernel's mixed precision exactly."""
    h = x.astype(jnp.bfloat16)
    n = len(params)
    for i, (w, b) in enumerate(params):
        h = jnp.dot(h, w.astype(jnp.bfloat16),
                    preferred_element_type=jnp.float32) + b.reshape(1, -1)
        if i < n - 1:
            h = jnp.maximum(h, 0.0).astype(jnp.bfloat16)
    return h


def reference_forward_f32(x, params):
    """Pure f32 reference (original PyTorch eval-mode semantics)."""
    h = x
    for i, (w, b) in enumerate(params):
        h = h @ w + b.reshape(1, -1)
        if i < len(params) - 1:
            h = jnp.maximum(h, 0.0)
    return h


if __name__ == "__main__":
    key = jax.random.PRNGKey(0)
    kp, kx = jax.random.split(key)
    params = init_params(kp)
    prepared = prepare_params(params)

    batch = 32
    x = jax.random.normal(kx, (batch, INPUT_SIZE), jnp.float32)

    # Default block_b; the >=2-grid-step cap makes this a 2-step grid (tb=16)
    # even at this small batch, exercising the multi-step pipeline.
    fwd = jax.jit(functools.partial(neural_net_forward))
    out = jax.block_until_ready(fwd(x, prepared))
    assert out.shape == (batch, NUM_CLASSES), out.shape

    # Tight check against a reference with identical bf16/f32 mixed precision.
    ref_bf16 = reference_forward_bf16(x, params)
    err_bf16 = float(jnp.max(jnp.abs(out - ref_bf16)))
    assert jnp.allclose(out, ref_bf16, atol=2e-3, rtol=2e-3), err_bf16

    # Loose check against the original full-f32 semantics.
    ref_f32 = reference_forward_f32(x, params)
    err_f32 = float(jnp.max(jnp.abs(out - ref_f32)))
    assert jnp.allclose(out, ref_f32, atol=5e-2, rtol=5e-2), err_f32

    print("KERNEL_OK")
</pallas_src>

<mosaic_0001>
module attributes {stable_mosaic.version = 11 : i64} {
  func.func @_mlp_kernel(%arg0: i32, %arg1: memref<16x24xf32, #tpu.memory_space<vmem>>, %arg2: memref<24x128xbf16, #tpu.memory_space<vmem>>, %arg3: memref<1x128xf32, #tpu.memory_space<vmem>>, %arg4: memref<128x128xbf16, #tpu.memory_space<vmem>>, %arg5: memref<1x128xf32, #tpu.memory_space<vmem>>, %arg6: memref<128x128xbf16, #tpu.memory_space<vmem>>, %arg7: memref<1x128xf32, #tpu.memory_space<vmem>>, %arg8: memref<128x10xbf16, #tpu.memory_space<vmem>>, %arg9: memref<1x10xf32, #tpu.memory_space<vmem>>, %arg10: memref<16x10xf32, #tpu.memory_space<vmem>>) attributes {dimension_semantics = [#tpu.dimension_semantics<parallel>], iteration_bounds = array<i64: 2>, scalar_prefetch = 0 : i64, scratch_operands = 0 : i64, tpu.core_type = #tpu.core_type<tc>, window_params = [{transform_indices = @transform_0, window_bounds = array<i64: 16, 24>}, {pipeline_mode = #tpu.pipeline_mode<synchronous>, transform_indices = @transform_1, window_bounds = array<i64: 24, 128>}, {pipeline_mode = #tpu.pipeline_mode<synchronous>, transform_indices = @transform_2, window_bounds = array<i64: 1, 128>}, {pipeline_mode = #tpu.pipeline_mode<synchronous>, transform_indices = @transform_3, window_bounds = array<i64: 128, 128>}, {pipeline_mode = #tpu.pipeline_mode<synchronous>, transform_indices = @transform_4, window_bounds = array<i64: 1, 128>}, {pipeline_mode = #tpu.pipeline_mode<synchronous>, transform_indices = @transform_5, window_bounds = array<i64: 128, 128>}, {pipeline_mode = #tpu.pipeline_mode<synchronous>, transform_indices = @transform_6, window_bounds = array<i64: 1, 128>}, {pipeline_mode = #tpu.pipeline_mode<synchronous>, transform_indices = @transform_7, window_bounds = array<i64: 128, 10>}, {pipeline_mode = #tpu.pipeline_mode<synchronous>, transform_indices = @transform_8, window_bounds = array<i64: 1, 10>}, {transform_indices = @transform_9, window_bounds = array<i64: 16, 10>}]} {
    %c0 = arith.constant 0 : index
    %c0_0 = arith.constant 0 : index
    %0 = vector.load %arg1[%c0, %c0_0] : memref<16x24xf32, #tpu.memory_space<vmem>>, vector<16x24xf32>
    %1 = arith.truncf %0 : vector<16x24xf32> to vector<16x24xbf16>
    %c0_1 = arith.constant 0 : index
    %c0_2 = arith.constant 0 : index
    %2 = vector.load %arg2[%c0_1, %c0_2] : memref<24x128xbf16, #tpu.memory_space<vmem>>, vector<24x128xbf16>
    %cst = arith.constant dense<0.000000e+00> : vector<16x128xf32>
    %3 = tpu.matmul %1, %2, %cst {dimension_numbers = #tpu.dot_dimension_numbers<[1], [0], [0], [1], [0, 0, 1, 1], [], []>} : vector<16x24xbf16>, vector<24x128xbf16>, vector<16x128xf32> -> vector<16x128xf32>
    %c0_3 = arith.constant 0 : index
    %c0_4 = arith.constant 0 : index
    %4 = vector.load %arg3[%c0_3, %c0_4] : memref<1x128xf32, #tpu.memory_space<vmem>>, vector<1x128xf32>
    %5 = vector.broadcast %4 : vector<1x128xf32> to vector<16x128xf32>
    %6 = arith.addf %3, %5 : vector<16x128xf32>
    %cst_5 = arith.constant 0.000000e+00 : f32
    %7 = vector.broadcast %cst_5 : f32 to vector<16x128xf32>
    %8 = arith.maximumf %6, %7 : vector<16x128xf32>
    %9 = arith.truncf %8 : vector<16x128xf32> to vector<16x128xbf16>
    %c0_6 = arith.constant 0 : index
    %c0_7 = arith.constant 0 : index
    %10 = vector.load %arg4[%c0_6, %c0_7] : memref<128x128xbf16, #tpu.memory_space<vmem>>, vector<128x128xbf16>
    %cst_8 = arith.constant dense<0.000000e+00> : vector<16x128xf32>
    %11 = tpu.matmul %9, %10, %cst_8 {dimension_numbers = #tpu.dot_dimension_numbers<[1], [0], [0], [1], [0, 0, 1, 1], [], []>} : vector<16x128xbf16>, vector<128x128xbf16>, vector<16x128xf32> -> vector<16x128xf32>
    %c0_9 = arith.constant 0 : index
    %c0_10 = arith.constant 0 : index
    %12 = vector.load %arg5[%c0_9, %c0_10] : memref<1x128xf32, #tpu.memory_space<vmem>>, vector<1x128xf32>
    %13 = vector.broadcast %12 : vector<1x128xf32> to vector<16x128xf32>
    %14 = arith.addf %11, %13 : vector<16x128xf32>
    %cst_11 = arith.constant 0.000000e+00 : f32
    %15 = vector.broadcast %cst_11 : f32 to vector<16x128xf32>
    %16 = arith.maximumf %14, %15 : vector<16x128xf32>
    %17 = arith.truncf %16 : vector<16x128xf32> to vector<16x128xbf16>
    %c0_12 = arith.constant 0 : index
    %c0_13 = arith.constant 0 : index
    %18 = vector.load %arg6[%c0_12, %c0_13] : memref<128x128xbf16, #tpu.memory_space<vmem>>, vector<128x128xbf16>
    %cst_14 = arith.constant dense<0.000000e+00> : vector<16x128xf32>
    %19 = tpu.matmul %17, %18, %cst_14 {dimension_numbers = #tpu.dot_dimension_numbers<[1], [0], [0], [1], [0, 0, 1, 1], [], []>} : vector<16x128xbf16>, vector<128x128xbf16>, vector<16x128xf32> -> vector<16x128xf32>
    %c0_15 = arith.constant 0 : index
    %c0_16 = arith.constant 0 : index
    %20 = vector.load %arg7[%c0_15, %c0_16] : memref<1x128xf32, #tpu.memory_space<vmem>>, vector<1x128xf32>
    %21 = vector.broadcast %20 : vector<1x128xf32> to vector<16x128xf32>
    %22 = arith.addf %19, %21 : vector<16x128xf32>
    %cst_17 = arith.constant 0.000000e+00 : f32
    %23 = vector.broadcast %cst_17 : f32 to vector<16x128xf32>
    %24 = arith.maximumf %22, %23 : vector<16x128xf32>
    %25 = arith.truncf %24 : vector<16x128xf32> to vector<16x128xbf16>
    %c0_18 = arith.constant 0 : index
    %c0_19 = arith.constant 0 : index
    %26 = vector.load %arg8[%c0_18, %c0_19] : memref<128x10xbf16, #tpu.memory_space<vmem>>, vector<128x10xbf16>
    %cst_20 = arith.constant dense<0.000000e+00> : vector<16x10xf32>
    %27 = tpu.matmul %25, %26, %cst_20 {dimension_numbers = #tpu.dot_dimension_numbers<[1], [0], [0], [1], [0, 0, 1, 1], [], []>} : vector<16x128xbf16>, vector<128x10xbf16>, vector<16x10xf32> -> vector<16x10xf32>
    %c0_21 = arith.constant 0 : index
    %c0_22 = arith.constant 0 : index
    %28 = vector.load %arg9[%c0_21, %c0_22] : memref<1x10xf32, #tpu.memory_space<vmem>>, vector<1x10xf32>
    %29 = vector.broadcast %28 : vector<1x10xf32> to vector<16x10xf32>
    %30 = arith.addf %27, %29 : vector<16x10xf32>
    %c0_23 = arith.constant 0 : index
    %c0_24 = arith.constant 0 : index
    %31 = vector.load %arg10[%c0_23, %c0_24] : memref<16x10xf32, #tpu.memory_space<vmem>>, vector<16x10xf32>
    tpu.vector_store %arg10[%c0_23, %c0_24], %30 {strides = array<i32>} : memref<16x10xf32, #tpu.memory_space<vmem>>, vector<16x10xf32>,
    return
  }
  func.func @transform_0(%arg0: i32) -> (i32, i32) {
    %c0_i32 = arith.constant 0 : i32
    %c0_i32_0 = arith.constant 0 : i32
    return %arg0, %c0_i32 : i32, i32
  }
  func.func @transform_1(%arg0: i32) -> (i32, i32) {
    %c0_i32 = arith.constant 0 : i32
    %c0_i32_0 = arith.constant 0 : i32
    %c0_i32_1 = arith.constant 0 : i32
    return %c0_i32, %c0_i32_0 : i32, i32
  }
  func.func @transform_2(%arg0: i32) -> (i32, i32) {
    %c0_i32 = arith.constant 0 : i32
    %c0_i32_0 = arith.constant 0 : i32
    %c0_i32_1 = arith.constant 0 : i32
    return %c0_i32, %c0_i32_0 : i32, i32
  }
  func.func @transform_3(%arg0: i32) -> (i32, i32) {
    %c0_i32 = arith.constant 0 : i32
    %c0_i32_0 = arith.constant 0 : i32
    %c0_i32_1 = arith.constant 0 : i32
    return %c0_i32, %c0_i32_0 : i32, i32
  }
  func.func @transform_4(%arg0: i32) -> (i32, i32) {
    %c0_i32 = arith.constant 0 : i32
    %c0_i32_0 = arith.constant 0 : i32
    %c0_i32_1 = arith.constant 0 : i32
    return %c0_i32, %c0_i32_0 : i32, i32
  }
  func.func @transform_5(%arg0: i32) -> (i32, i32) {
    %c0_i32 = arith.constant 0 : i32
    %c0_i32_0 = arith.constant 0 : i32
    %c0_i32_1 = arith.constant 0 : i32
    return %c0_i32, %c0_i32_0 : i32, i32
  }
  func.func @transform_6(%arg0: i32) -> (i32, i32) {
    %c0_i32 = arith.constant 0 : i32
    %c0_i32_0 = arith.constant 0 : i32
    %c0_i32_1 = arith.constant 0 : i32
    return %c0_i32, %c0_i32_0 : i32, i32
  }
  func.func @transform_7(%arg0: i32) -> (i32, i32) {
    %c0_i32 = arith.constant 0 : i32
    %c0_i32_0 = arith.constant 0 : i32
    %c0_i32_1 = arith.constant 0 : i32
    return %c0_i32, %c0_i32_0 : i32, i32
  }
  func.func @transform_8(%arg0: i32) -> (i32, i32) {
    %c0_i32 = arith.constant 0 : i32
    %c0_i32_0 = arith.constant 0 : i32
    %c0_i32_1 = arith.constant 0 : i32
    return %c0_i32, %c0_i32_0 : i32, i32
  }
  func.func @transform_9(%arg0: i32) -> (i32, i32) {
    %c0_i32 = arith.constant 0 : i32
    %c0_i32_0 = arith.constant 0 : i32
    return %arg0, %c0_i32 : i32, i32
  }
}

</mosaic_0001>

<bundles_post_ra>
// kernel: neural_net_forward.1
= control target key start
LH: loop header
LB: loop body
LE: loop exit
PB: predicated region body
PF: predicated region fallthrough
CT: control target
= control target key end

     0   :  { %14 = vsyncpa [#allocation3], 0  ;;  %s980_s30 = smov 0   ;;  %s1073_s0 = inlined_call_operand.vmem [shape: f32[32,24], index: 0, kind: input, shape index: {}]   ;;  %s1074_s1 = inlined_call_operand.vmem [shape: bf16[24,128], index: 1, kind: input, shape index: {}]   ;;  %s1075_s2 = inlined_call_operand.vmem [shape: f32[1,128], index: 2, kind: input, shape index: {}]   ;;  %s1076_s3 = inlined_call_operand.vmem [shape: bf16[128,128], index: 3, kind: input, shape index: {}]   ;;  %s1077_s4 = inlined_call_operand.vmem [shape: f32[1,128], index: 4, kind: input, shape index: {}]   ;;  %s1078_s5 = inlined_call_operand.hbm [shape: bf16[128,128], index: 5, kind: input, shape index: {}]   ;;  %s1079_s6 = inlined_call_operand.vmem [shape: f32[1,128], index: 6, kind: input, shape index: {}]   ;;  %s1080_s7 = inlined_call_operand.vmem [shape: bf16[128,10], index: 7, kind: input, shape index: {}]   ;;  %s1081_s8 = inlined_call_operand.vmem [shape: f32[1,10], index: 8, kind: input, shape index: {}]   ;;  %s1082_s9 = inlined_call_operand.vmem [shape: f32[32,10], index: 9, kind: output, shape index: {}]  }
   0x1 LB: > { %s268_s12 = sshll.u32 %s1078_s5, 4  ;;  %s721_s13 = sadd.s32 4294967295, %s925_s30   ;;  %s925_s30 = sphi %s980_s30, %s20_s30   ;;  %s269_s12 = int_to_ptr.hbm [resolvable:$true] %s268_s12 }
   0x2   : > { %p723_p0 = scmp.ge.s32.totalorder %s925_s30, 1  ;;  %p245_p1 = scmp.lt.s32.totalorder %s925_s30, 3 }
   0x3   : > { %p868_p2 = scmp.eq.s32.totalorder %s721_s13, 0  ;;  %s927_s14 = smov [#allocation2]  }
   0x4   : > { %p246_p3 = pnand %p723_p0, %p245_p1  ;;  %s270_s15 = sshll.u32 %s927_s14, 4  ;;  %s271_s15 = int_to_ptr.vmem [resolvable:$true] %s270_s15 }
   0x5   : > { %s928_s16 = smov 64   ;;  %s929_s17 = smov 4  }
   0x6   : > { %p864_p4 = pneg %p246_p3  ;;  %304 = sbr.rel (%p246_p3) target bundleno = 594 (0x252), region = 56 }
   0x8   : > { %p865_p5 = pnand %p868_p2, %p864_p4 }
   0xa   : > { %867 = dma.hbm_to_vmem [thread:$0]  (!%p865_p5), %s269_s12, 1024, %s271_s15, [#allocation3], %s928_s16, %s928_s16, %s929_s17  }
   0xb   : > { %920 = dma.done.wait (%p868_p2), [#allocation3], 1024  }
   0xc   : > { %922 = vsyncadd (%p868_p2), [#allocation3], 4294966272  ;;  %s728_s18 = sshll.u32 %s721_s13, 1  ;;  %v359_v0 = vld [vmem:[%s1074_s1 + $0x8] sm:$0xf]  ;;  %v843_v2 = vld [vmem:[%s1076_s3 + $0x38] sm:$0xff] }
   0xd   : > { %p342_p6 = scmp.lt.s32.totalorder %s728_s18, 3  ;;  %v369_v1 = vunpack.c.l.b16 %v359_v0  ;;  %vm377_vm0 = vcmask 1043456   ;;  %466 = vmatpush.bf16.msra.mxu1 %v843_v2  ;;  %v842_v4 = vld [vmem:[%s1076_s3 + $0x30] sm:$0xff]  ;;  %v835_v6 = vld [vmem:[%s1074_s1] sm:$0xff]  ;;  %v841_v9 = vld [vmem:[%s1076_s3 + $0x28] sm:$0xff]  ;;  %vm373_vm1 = vcmask 195584  }
   0xe   : > { %v840_v11 = vld [vmem:[%s1076_s3 + $0x20] sm:$0xff]  ;;  %v839_v12 = vld [vmem:[%s1076_s3 + $0x18] sm:$0xff]  ;;  %v838_v13 = vld [vmem:[%s1076_s3 + $0x10] sm:$0xff]  ;;  %vm650_vm2 = vcmask 80896  }
   0xf   : > { %s1084_s18 = smov (!%p342_p6, %s728_s18), 3  ;;  %v371_v3 = vpack.c.b16 %v369_v1, %v369_v1  ;;  %v837_v14 = vld [vmem:[%s1076_s3 + $0x8] sm:$0xff]  ;;  %v836_v15 = vld [vmem:[%s1076_s3] sm:$0xff]  ;;  %v851_v16 = vld [vmem:[#allocation2 + $0x38] sm:$0xff] }
  0x10   : > { %s729_s21 = sshll.u32 %s1084_s18, 3  ;;  %551 = vmatpush.bf16.msra.mxu2 %v851_v16  ;;  %v850_v17 = vld [vmem:[#allocation2 + $0x30] sm:$0xff]  ;;  %v849_v18 = vld [vmem:[#allocation2 + $0x28] sm:$0xff]  ;;  %v848_v19 = vld [vmem:[#allocation2 + $0x20] sm:$0xff] }
  0x11   : > { %s345_s26 = scalar_lea.vmem %s1073_s0, %s729_s21  ;;  %v379_v5 = vsel %vm377_vm0, %v371_v3, 0  ;;  %467 = vmatpush.bf16.msra.mxu1 %v842_v4  ;;  %v881_v21 = vld [vmem:[%s1075_s2] ss:$0 sm:$0xff]  ;;  %v847_v28 = vld [vmem:[#allocation2 + $0x18] sm:$0xff]  ;;  %v846_v29 = vld [vmem:[#allocation2 + $0x10] sm:$0xff]  ;;  %s351_s13 = scalar_lea.vmem %s1082_s9, %s729_s21 }
  0x12   : > { %387 = vmatpush.bf16.msra.mxu0 %v379_v5  ;;  %v354_v7 = vld [vmem:[%s345_s26] sm:$0xff]  ;;  %v355_v8 = vld [vmem:[%s345_s26 + $0x8] sm:$0xff]  ;;  %v859_v32 = vld [vmem:[%s1080_s7 + $0x38] sm:$0xff] }
  0x13   : > { %v356_v10 = vpack.c.bf16 %v355_v8, %v354_v7  ;;  %v845_v30 = vld [vmem:[#allocation2 + $0x8] sm:$0xff]  ;;  %v844_v31 = vld [vmem:[#allocation2] sm:$0xff]  ;;  %636 = vmatpush.bf16.msra.mxu3 %v859_v32  ;;  %v858_v33 = vld [vmem:[%s1080_s7 + $0x30] sm:$0xff] }
  0x14   : > { %552 = vmatpush.bf16.msra.mxu2 %v850_v17  ;;  %v857_v34 = vld [vmem:[%s1080_s7 + $0x28] sm:$0xff]  ;;  %v856_v35 = vld [vmem:[%s1080_s7 + $0x20] sm:$0xff]  ;;  %v855_v44 = vld [vmem:[%s1080_s7 + $0x18] sm:$0xff] }
  0x15   : > { %468 = vmatpush.bf16.msra.mxu1 %v841_v9  ;;  %v882_v37 = vld [vmem:[%s1077_s4] ss:$0 sm:$0xff]  ;;  %v854_v45 = vld [vmem:[%s1080_s7 + $0x10] sm:$0xff]  ;;  %v853_v46 = vld [vmem:[%s1080_s7 + $0x8] sm:$0xff] }
  0x16   : > { %388 = vmatpush.bf16.msra.mxu0 %v835_v6  ;;  %v852_v47 = vld [vmem:[%s1080_s7] sm:$0xff] }
  0x17   : > { %637 = vmatpush.bf16.msra.mxu3 %v858_v33  ;;  %v883_v49 = vld [vmem:[%s1079_s6] ss:$0 sm:$0xff] }
  0x18   : > { %553 = vmatpush.bf16.msra.mxu2 %v849_v18  ;;  %v884_v56 = vld [vmem:[%s1081_s8] ss:$0 sm:$0xff] }
  0x19   : > { %736 = vmatmul.msk.bf16.vlgmr.msra.gmra.mxu0 %vm373_vm1, %v356_v10  ;;  %469 = vmatpush.bf16.msra.mxu1 %v840_v11 }
  0x1b   : > { %638 = vmatpush.bf16.msra.mxu3 %v857_v34 }
  0x1c   : > { %554 = vmatpush.bf16.msra.mxu2 %v848_v19 }
  0x1d   : > { %470 = vmatpush.bf16.msra.mxu1 %v839_v12 }
  0x1f   : > { %639 = vmatpush.bf16.msra.mxu3 %v856_v35 }
  0x20   : > { %555 = vmatpush.bf16.msra.mxu2 %v847_v28 }
  0x21   : > { %471 = vmatpush.bf16.msra.mxu1 %v838_v13 }
  0x23   : > { %640 = vmatpush.bf16.msra.mxu3 %v855_v44 }
  0x24   : > { %556 = vmatpush.bf16.msra.mxu2 %v846_v29 }
  0x25   : > { %472 = vmatpush.bf16.msra.mxu1 %v837_v14 }
  0x27   : > { %641 = vmatpush.bf16.msra.mxu3 %v854_v45 }
  0x28   : > { %557 = vmatpush.bf16.msra.mxu2 %v845_v30 }
  0x29   : > { %473 = vmatpush.bf16.msra.mxu1 %v836_v15 }
  0x2b   : > { %642 = vmatpush.bf16.msra.mxu3 %v853_v46 }
  0x2c   : > { %558 = vmatpush.bf16.msra.mxu2 %v844_v31 }
  0x2f   : > { %643 = vmatpush.bf16.msra.mxu3 %v852_v47 }
  0x96   : > { %v390_v20 = vpop.f32.mrf.mxu0 }
  0x97   : > { %v391_v22 = vadd.f32 %v881_v21, %v390_v20 }
  0x99   : > { %v395_v25 = vmax.f32 %v391_v22, 0.0 }
  0x9e   : > { %v392_v23 = vpop.f32.mrf.mxu0 }
  0x9f   : > { %v393_v24 = vadd.f32 %v881_v21, %v392_v23 }
  0xa1   : > { %v396_v26 = vmax.f32 %v393_v24, 0.0 }
  0xa3   : > { %v397_v27 = vpack.c.bf16 %v396_v26, %v395_v25 }
  0xa5   : > { %474 = vmatmul.bf16.vlgmr.msra.gmra.mxu1 %v397_v27 }
 0x122   : > { %v475_v36 = vpop.f32.mrf.mxu1 }
 0x123   : > { %v476_v38 = vadd.f32 %v882_v37, %v475_v36 }
 0x125   : > { %v480_v41 = vmax.f32 %v476_v38, 0.0 }
 0x12a   : > { %v477_v39 = vpop.f32.mrf.mxu1 }
 0x12b   : > { %v478_v40 = vadd.f32 %v882_v37, %v477_v39 }
 0x12d   : > { %v481_v42 = vmax.f32 %v478_v40, 0.0 }
 0x12f   : > { %v482_v43 = vpack.c.bf16 %v481_v42, %v480_v41 }
 0x131   : > { %559 = vmatmul.bf16.vlgmr.msra.gmra.mxu2 %v482_v43 }
 0x1b4   : > { %v560_v48 = vpop.f32.mrf.mxu2 }
 0x1b5   : > { %v561_v50 = vadd.f32 %v883_v49, %v560_v48 }
 0x1b7   : > { %v565_v53 = vmax.f32 %v561_v50, 0.0 }
 0x1bc   : > { %v562_v51 = vpop.f32.mrf.mxu2 }
 0x1bd   : > { %v563_v52 = vadd.f32 %v883_v49, %v562_v51 }
 0x1bf   : > { %v566_v54 = vmax.f32 %v563_v52, 0.0 }
 0x1c1   : > { %v567_v55 = vpack.c.bf16 %v566_v54, %v565_v53 }
 0x1c3   : > { %644 = vmatmul.bf16.vlgmr.msra.gmra.mxu3 %v567_v55 }
 0x246   : > { %v645_v57 = vpop.f32.mrf.mxu3 }
 0x247   : > { %v646_v58 = vadd.f32 %v884_v56, %v645_v57 }
 0x249   : > { %651 = vst.msk [vmem:[%s351_s13] sm:$0xff] %vm650_vm2, %v646_v58 }
 0x24e   : > { %v647_v59 = vpop.f32.mrf.mxu3 }
 0x24f   : > { %v648_v60 = vadd.f32 %v884_v56, %v647_v59 }
 0x251   : > { %652 = vst.msk [vmem:[%s351_s13 + $0x8] sm:$0xff] %vm650_vm2, %v648_v60 }
 0x252 PF: > { %s20_s30 = sadd.s32 1, %s925_s30  }
 0x253   : > { %p17_p7 = scmp.ge.s32.totalorder %s20_s30, 4  }
 0x255   :  { %19 = sbr.rel (!%p17_p7) target bundleno = 1 (0x1), region = 91 }
 0x25a   :  { %675 = vsyncpa [#allocation3], 1 }
 0x25b   :  { %677 = vsyncpa [#allocation3 + $0x1], 1 }

</bundles_post_ra>
